<compile_context>
chip_gen: v6e
topology: v6e:2x2x1
jax: 0.10.0
libtpu: 0.0.40
codegen_flags: <defaults>
</compile_context>

<pallas_src>
import functools

import jax
import jax.numpy as jnp
from jax import lax
from jax.experimental import pallas as pl
from jax.experimental.pallas import tpu as pltpu

_LANE = 128


def _round_up(x, m):
    return (x + m - 1) // m * m


# ---------------------------------------------------------------------------
# Pallas kernel: conv3x3 -> LeakyReLU(0.2) -> conv3x3 -> tanh
# All nb images of a step are processed as one wide (C, nb*HWp) plane.
# ---------------------------------------------------------------------------
def final_block_kernel(x_ref, m_ref, w1_ref, w2_ref, o_ref, *, W):
    # x_ref : (Cin,  L)       L = nb*HWp, flattened channel-major planes (lanes)
    # m_ref : (8,    L)       precomputed border masks for the 8 non-center taps
    # w1_ref: (Cmid, 9*Cin)   spectral-normalized conv1, im2col layout
    # w2_ref: (Cout, 9*Cmid)  spectral-normalized conv2, im2col layout
    # o_ref : (Cout, L)       lane-dense output store
    L = x_ref.shape[-1]
    m = m_ref[...]
    w1 = w1_ref[...]
    w2 = w2_ref[...]

    def im2col(plane):
        # plane (C, L) -> (9*C, L), tap-major / channel-minor (matches the
        # weight reshape in the wrapper).  Each tap is an XLU lane rotation of
        # the whole nb-image-wide plane, gated by its precomputed mask.
        pieces = []
        mi = 0
        for dy in range(3):
            for dx in range(3):
                if (dy, dx) == (1, 1):
                    pieces.append(plane)              # center tap: no shift/mask
                else:
                    s = (dy - 1) * W + (dx - 1)       # flat source offset
                    # rolled[:, i] = plane[:, (i + s) mod L]
                    rolled = pltpu.roll(plane, (-s) % L, axis=1)
                    pieces.append(rolled * m[mi:mi + 1, :])
                    mi += 1
        return jnp.concatenate(pieces, axis=0)

    x = x_ref[...]                                                    # (Cin, L)
    h = jnp.dot(w1, im2col(x), preferred_element_type=jnp.float32)    # (Cmid, L)
    h = jnp.maximum(h, 0.2 * h)                                       # LeakyReLU(0.2)
    y = jnp.dot(w2, im2col(h), preferred_element_type=jnp.float32)    # (Cout, L)
    o_ref[...] = jnp.tanh(y).astype(o_ref.dtype)


# ---------------------------------------------------------------------------
# Wrapper helpers
# ---------------------------------------------------------------------------
def _tap_masks_host(H, W, HWp, dtype):
    """(8, HWp) masks for the 8 non-center taps (row-major (dy,dx) order),
    built ONCE in the wrapper (hoisted out of the kernel).  Positions >= H*W
    (lane-axis padding) are marked invalid so padded activations stay zero."""
    HW = H * W
    j = jnp.arange(HWp, dtype=jnp.int32)
    valid = j < HW
    y = j // W
    x = j - y * W
    rows = []
    for dy in range(3):
        for dx in range(3):
            if (dy, dx) == (1, 1):
                continue                              # skip always-true center
            ky, kx = dy - 1, dx - 1
            rows.append(valid & (y + ky >= 0) & (y + ky < H)
                        & (x + kx >= 0) & (x + kx < W))
    return jnp.stack(rows, axis=0).astype(dtype)      # (8, HWp)


def _pick_images_per_step(N, HWp, Cin, Cmid, Cout, itemsize):
    """Largest divisor of N that (a) keeps >= 2 grid steps when N >= 2 so the
    v7x megacore can split the batch across its two TensorCores, and (b) keeps
    the per-step VMEM footprint (double-buffered I/O + masks + both im2col
    patch matrices + temporaries) around ~12 MiB on every generation."""
    per_image = itemsize * HWp * (
        2 * (Cin + Cout)            # double-buffered x / o blocks
        + 2 * 8                     # mask block (double-buffered)
        + 9 * Cin + 9 * Cmid        # im2col patch matrices
        + 4 * (Cmid + Cout))        # h / y / misc f32 temporaries
    cap = max(1, (12 * 1024 * 1024) // per_image)
    target = max(1, min(cap, N // 2 if N >= 2 else 1))
    nb = 1
    for d in range(1, target + 1):
        if N % d == 0:
            nb = d
    return nb


# ---------------------------------------------------------------------------
# Wrapper: planar re-layout + pallas_call
# ---------------------------------------------------------------------------
def final_block_pallas(x_nchw, w1_sn, w2_sn, *, images_per_step=None):
    """x_nchw: (N, Cin, H, W); w*_sn: OIHW spectral-normalized conv weights."""
    N, Cin, H, W = x_nchw.shape
    Cmid, Cout = w1_sn.shape[0], w2_sn.shape[0]
    HW = H * W
    HWp = _round_up(HW, _LANE)                 # lane axis: multiple of 128
    itemsize = jnp.dtype(x_nchw.dtype).itemsize

    nb = (images_per_step if images_per_step is not None
          else _pick_images_per_step(N, HWp, Cin, Cmid, Cout, itemsize))
    assert N % nb == 0, (N, nb)
    L = nb * HWp

    # Channel-major planar layout (Cin, N*HWp): one tiny XLA transpose of the
    # activations buys a contiguous lane-dense slab per step, an nb*HWp-wide
    # batched matmul RHS inside the kernel, and fully lane-dense output stores.
    x_pl = jnp.transpose(x_nchw, (1, 0, 2, 3)).reshape(Cin, N, HW)
    if HWp != HW:
        x_pl = jnp.pad(x_pl, ((0, 0), (0, 0), (0, HWp - HW)))
    x_pl = x_pl.reshape(Cin, N * HWp)

    # Border masks, tiled per image across one block (identical for all steps).
    masks = jnp.tile(_tap_masks_host(H, W, HWp, x_nchw.dtype), (1, nb))   # (8, L)

    # OIHW -> (O, ky, kx, I) -> (O, 9*I): K-dim is tap-major / channel-minor,
    # matching the patch-matrix row order built in the kernel.
    w1_mat = jnp.transpose(w1_sn, (0, 2, 3, 1)).reshape(Cmid, 9 * Cin)
    w2_mat = jnp.transpose(w2_sn, (0, 2, 3, 1)).reshape(Cout, 9 * Cmid)

    flops = 2 * N * HW * 9 * (Cin * Cmid + Cmid * Cout)
    bytes_accessed = itemsize * (N * HWp * (Cin + Cout) + 8 * L
                                 + 9 * (Cin * Cmid + Cmid * Cout))

    out_pl = pl.pallas_call(
        functools.partial(final_block_kernel, W=W),
        out_shape=jax.ShapeDtypeStruct((Cout, N * HWp), x_nchw.dtype),
        grid=(N // nb,),
        in_specs=[
            pl.BlockSpec((Cin, L), lambda n: (0, n)),
            pl.BlockSpec((8, L), lambda n: (0, 0)),          # hoisted masks
            pl.BlockSpec((Cmid, 9 * Cin), lambda n: (0, 0)),
            pl.BlockSpec((Cout, 9 * Cmid), lambda n: (0, 0)),
        ],
        out_specs=pl.BlockSpec((Cout, L), lambda n: (0, n)),
        compiler_params=pltpu.CompilerParams(
            # grid steps are independent image groups -> v7x megacore split
            dimension_semantics=("parallel",),
            vmem_limit_bytes=32 * 1024 * 1024),
        cost_estimate=pl.CostEstimate(
            flops=flops,
            transcendentals=N * HW * Cout,                    # tanh
            bytes_accessed=bytes_accessed),
    )(x_pl, masks, w1_mat, w2_mat)

    out = out_pl.reshape(Cout, N, HWp)[:, :, :HW].reshape(Cout, N, H, W)
    return jnp.transpose(out, (1, 0, 2, 3))


# ---------------------------------------------------------------------------
# Spectral norm (one power iteration) -- parameter preprocessing in plain JAX.
# ---------------------------------------------------------------------------
def _l2normalize(v, eps=1e-12):
    return v / (jnp.linalg.norm(v) + eps)


def spectral_normalize(w_oihw, u, power_iterations=1):
    out_ch = w_oihw.shape[0]
    w_mat = w_oihw.reshape(out_ch, -1)
    v = None
    for _ in range(power_iterations):
        v = _l2normalize(w_mat.T @ u)
        u = _l2normalize(w_mat @ v)
    sigma = u @ (w_mat @ v)
    return w_oihw / sigma


# ---------------------------------------------------------------------------
# Pure-JAX reference (correctness check)
# ---------------------------------------------------------------------------
def ref_forward(x_nchw, w1_sn, w2_sn):
    dn = ("NCHW", "OIHW", "NCHW")
    y = lax.conv_general_dilated(x_nchw, w1_sn, (1, 1), "SAME",
                                 dimension_numbers=dn)
    y = jnp.where(y > 0, y, 0.2 * y)
    y = lax.conv_general_dilated(y, w2_sn, (1, 1), "SAME",
                                 dimension_numbers=dn)
    return jnp.tanh(y)


if __name__ == "__main__":
    def run_case(case, N, in_size, out_size, H, W, images_per_step=None):
        mid = in_size // 2
        key = jax.random.fold_in(jax.random.PRNGKey(0), case)
        k_x, k_w1, k_w2, k_u1, k_u2 = jax.random.split(key, 5)

        x = jax.random.normal(k_x, (N, in_size, H, W), jnp.float32)
        w1 = jax.random.normal(k_w1, (mid, in_size, 3, 3), jnp.float32) * 0.1
        w2 = jax.random.normal(k_w2, (out_size, mid, 3, 3), jnp.float32) * 0.1
        u1 = _l2normalize(jax.random.normal(k_u1, (mid,), jnp.float32))
        u2 = _l2normalize(jax.random.normal(k_u2, (out_size,), jnp.float32))

        w1_sn = spectral_normalize(w1, u1)
        w2_sn = spectral_normalize(w2, u2)

        out = jax.block_until_ready(
            final_block_pallas(x, w1_sn, w2_sn, images_per_step=images_per_step))
        ref = jax.block_until_ready(ref_forward(x, w1_sn, w2_sn))

        assert out.shape == (N, out_size, H, W), out.shape
        max_err = float(jnp.max(jnp.abs(out - ref)))
        assert jnp.allclose(out, ref, atol=2e-4, rtol=2e-4), (case, max_err)

    # Primary small shape consistent with FinalBlock(in_size=4, out_size=2).
    run_case(0, N=2, in_size=4, out_size=2, H=16, W=16)
    # Multi-image-per-step path: nb=4 -> one 1024-lane-wide batched RHS per step.
    run_case(1, N=8, in_size=4, out_size=2, H=16, W=16, images_per_step=4)
    # H*W not a multiple of 128 -> wrapper pads the flattened spatial axis.
    run_case(2, N=2, in_size=4, out_size=2, H=10, W=10)

    print("KERNEL_OK")
</pallas_src>

<mosaic_0001>
module attributes {stable_mosaic.version = 11 : i64} {
  func.func @final_block_kernel(%arg0: i32, %arg1: memref<4x256xf32, #tpu.memory_space<vmem>>, %arg2: memref<8x256xf32, #tpu.memory_space<vmem>>, %arg3: memref<2x36xf32, #tpu.memory_space<vmem>>, %arg4: memref<2x18xf32, #tpu.memory_space<vmem>>, %arg5: memref<2x256xf32, #tpu.memory_space<vmem>>) attributes {dimension_semantics = [#tpu.dimension_semantics<parallel>], iteration_bounds = array<i64: 2>, scalar_prefetch = 0 : i64, scratch_operands = 0 : i64, tpu.core_type = #tpu.core_type<tc>, window_params = [{transform_indices = @transform_0, window_bounds = array<i64: 4, 256>}, {pipeline_mode = #tpu.pipeline_mode<synchronous>, transform_indices = @transform_1, window_bounds = array<i64: 8, 256>}, {pipeline_mode = #tpu.pipeline_mode<synchronous>, transform_indices = @transform_2, window_bounds = array<i64: 2, 36>}, {pipeline_mode = #tpu.pipeline_mode<synchronous>, transform_indices = @transform_3, window_bounds = array<i64: 2, 18>}, {transform_indices = @transform_4, window_bounds = array<i64: 2, 256>}]} {
    %c0 = arith.constant 0 : index
    %c0_0 = arith.constant 0 : index
    %0 = vector.load %arg2[%c0, %c0_0] : memref<8x256xf32, #tpu.memory_space<vmem>>, vector<8x256xf32>
    %c0_1 = arith.constant 0 : index
    %c0_2 = arith.constant 0 : index
    %1 = vector.load %arg3[%c0_1, %c0_2] : memref<2x36xf32, #tpu.memory_space<vmem>>, vector<2x36xf32>
    %c0_3 = arith.constant 0 : index
    %c0_4 = arith.constant 0 : index
    %2 = vector.load %arg4[%c0_3, %c0_4] : memref<2x18xf32, #tpu.memory_space<vmem>>, vector<2x18xf32>
    %c0_5 = arith.constant 0 : index
    %c0_6 = arith.constant 0 : index
    %3 = vector.load %arg1[%c0_5, %c0_6] : memref<4x256xf32, #tpu.memory_space<vmem>>, vector<4x256xf32>
    %c17_i32 = arith.constant 17 : i32
    %4 = tpu.dynamic_rotate %3 by %c17_i32 dim 1 : vector<4x256xf32>, i32 -> vector<4x256xf32>
    %5 = vector.extract_strided_slice %0 {offsets = [0, 0], sizes = [1, 256], strides = [1, 1]} : vector<8x256xf32> to vector<1x256xf32>
    %6 = vector.broadcast %5 : vector<1x256xf32> to vector<4x256xf32>
    %7 = arith.mulf %4, %6 : vector<4x256xf32>
    %c16_i32 = arith.constant 16 : i32
    %8 = tpu.dynamic_rotate %3 by %c16_i32 dim 1 : vector<4x256xf32>, i32 -> vector<4x256xf32>
    %9 = vector.extract_strided_slice %0 {offsets = [1, 0], sizes = [1, 256], strides = [1, 1]} : vector<8x256xf32> to vector<1x256xf32>
    %10 = vector.broadcast %9 : vector<1x256xf32> to vector<4x256xf32>
    %11 = arith.mulf %8, %10 : vector<4x256xf32>
    %c15_i32 = arith.constant 15 : i32
    %12 = tpu.dynamic_rotate %3 by %c15_i32 dim 1 : vector<4x256xf32>, i32 -> vector<4x256xf32>
    %13 = vector.extract_strided_slice %0 {offsets = [2, 0], sizes = [1, 256], strides = [1, 1]} : vector<8x256xf32> to vector<1x256xf32>
    %14 = vector.broadcast %13 : vector<1x256xf32> to vector<4x256xf32>
    %15 = arith.mulf %12, %14 : vector<4x256xf32>
    %c1_i32 = arith.constant 1 : i32
    %16 = tpu.dynamic_rotate %3 by %c1_i32 dim 1 : vector<4x256xf32>, i32 -> vector<4x256xf32>
    %17 = vector.extract_strided_slice %0 {offsets = [3, 0], sizes = [1, 256], strides = [1, 1]} : vector<8x256xf32> to vector<1x256xf32>
    %18 = vector.broadcast %17 : vector<1x256xf32> to vector<4x256xf32>
    %19 = arith.mulf %16, %18 : vector<4x256xf32>
    %c255_i32 = arith.constant 255 : i32
    %20 = tpu.dynamic_rotate %3 by %c255_i32 dim 1 : vector<4x256xf32>, i32 -> vector<4x256xf32>
    %21 = vector.extract_strided_slice %0 {offsets = [4, 0], sizes = [1, 256], strides = [1, 1]} : vector<8x256xf32> to vector<1x256xf32>
    %22 = vector.broadcast %21 : vector<1x256xf32> to vector<4x256xf32>
    %23 = arith.mulf %20, %22 : vector<4x256xf32>
    %c241_i32 = arith.constant 241 : i32
    %24 = tpu.dynamic_rotate %3 by %c241_i32 dim 1 : vector<4x256xf32>, i32 -> vector<4x256xf32>
    %25 = vector.extract_strided_slice %0 {offsets = [5, 0], sizes = [1, 256], strides = [1, 1]} : vector<8x256xf32> to vector<1x256xf32>
    %26 = vector.broadcast %25 : vector<1x256xf32> to vector<4x256xf32>
    %27 = arith.mulf %24, %26 : vector<4x256xf32>
    %c240_i32 = arith.constant 240 : i32
    %28 = tpu.dynamic_rotate %3 by %c240_i32 dim 1 : vector<4x256xf32>, i32 -> vector<4x256xf32>
    %29 = vector.extract_strided_slice %0 {offsets = [6, 0], sizes = [1, 256], strides = [1, 1]} : vector<8x256xf32> to vector<1x256xf32>
    %30 = vector.broadcast %29 : vector<1x256xf32> to vector<4x256xf32>
    %31 = arith.mulf %28, %30 : vector<4x256xf32>
    %c239_i32 = arith.constant 239 : i32
    %32 = tpu.dynamic_rotate %3 by %c239_i32 dim 1 : vector<4x256xf32>, i32 -> vector<4x256xf32>
    %33 = vector.extract_strided_slice %0 {offsets = [7, 0], sizes = [1, 256], strides = [1, 1]} : vector<8x256xf32> to vector<1x256xf32>
    %34 = vector.broadcast %33 : vector<1x256xf32> to vector<4x256xf32>
    %35 = arith.mulf %32, %34 : vector<4x256xf32>
    %36 = tpu.concatenate %7, %11, %15, %19, %3, %23, %27, %31, %35 in 0 : vector<4x256xf32>, vector<4x256xf32>, vector<4x256xf32>, vector<4x256xf32>, vector<4x256xf32>, vector<4x256xf32>, vector<4x256xf32>, vector<4x256xf32>, vector<4x256xf32> -> vector<36x256xf32>
    %cst = arith.constant dense<0.000000e+00> : vector<2x256xf32>
    %37 = tpu.matmul %1, %36, %cst {dimension_numbers = #tpu.dot_dimension_numbers<[1], [0], [0], [1], [0, 0, 1, 1], [], []>} : vector<2x36xf32>, vector<36x256xf32>, vector<2x256xf32> -> vector<2x256xf32>
    %cst_7 = arith.constant 2.000000e-01 : f32
    %38 = vector.broadcast %cst_7 : f32 to vector<2x256xf32>
    %39 = arith.mulf %38, %37 : vector<2x256xf32>
    %40 = arith.maximumf %37, %39 : vector<2x256xf32>
    %c17_i32_8 = arith.constant 17 : i32
    %41 = tpu.dynamic_rotate %40 by %c17_i32_8 dim 1 : vector<2x256xf32>, i32 -> vector<2x256xf32>
    %42 = vector.extract_strided_slice %0 {offsets = [0, 0], sizes = [1, 256], strides = [1, 1]} : vector<8x256xf32> to vector<1x256xf32>
    %43 = vector.broadcast %42 : vector<1x256xf32> to vector<2x256xf32>
    %44 = arith.mulf %41, %43 : vector<2x256xf32>
    %c16_i32_9 = arith.constant 16 : i32
    %45 = tpu.dynamic_rotate %40 by %c16_i32_9 dim 1 : vector<2x256xf32>, i32 -> vector<2x256xf32>
    %46 = vector.extract_strided_slice %0 {offsets = [1, 0], sizes = [1, 256], strides = [1, 1]} : vector<8x256xf32> to vector<1x256xf32>
    %47 = vector.broadcast %46 : vector<1x256xf32> to vector<2x256xf32>
    %48 = arith.mulf %45, %47 : vector<2x256xf32>
    %c15_i32_10 = arith.constant 15 : i32
    %49 = tpu.dynamic_rotate %40 by %c15_i32_10 dim 1 : vector<2x256xf32>, i32 -> vector<2x256xf32>
    %50 = vector.extract_strided_slice %0 {offsets = [2, 0], sizes = [1, 256], strides = [1, 1]} : vector<8x256xf32> to vector<1x256xf32>
    %51 = vector.broadcast %50 : vector<1x256xf32> to vector<2x256xf32>
    %52 = arith.mulf %49, %51 : vector<2x256xf32>
    %c1_i32_11 = arith.constant 1 : i32
    %53 = tpu.dynamic_rotate %40 by %c1_i32_11 dim 1 : vector<2x256xf32>, i32 -> vector<2x256xf32>
    %54 = vector.extract_strided_slice %0 {offsets = [3, 0], sizes = [1, 256], strides = [1, 1]} : vector<8x256xf32> to vector<1x256xf32>
    %55 = vector.broadcast %54 : vector<1x256xf32> to vector<2x256xf32>
    %56 = arith.mulf %53, %55 : vector<2x256xf32>
    %c255_i32_12 = arith.constant 255 : i32
    %57 = tpu.dynamic_rotate %40 by %c255_i32_12 dim 1 : vector<2x256xf32>, i32 -> vector<2x256xf32>
    %58 = vector.extract_strided_slice %0 {offsets = [4, 0], sizes = [1, 256], strides = [1, 1]} : vector<8x256xf32> to vector<1x256xf32>
    %59 = vector.broadcast %58 : vector<1x256xf32> to vector<2x256xf32>
    %60 = arith.mulf %57, %59 : vector<2x256xf32>
    %c241_i32_13 = arith.constant 241 : i32
    %61 = tpu.dynamic_rotate %40 by %c241_i32_13 dim 1 : vector<2x256xf32>, i32 -> vector<2x256xf32>
    %62 = vector.extract_strided_slice %0 {offsets = [5, 0], sizes = [1, 256], strides = [1, 1]} : vector<8x256xf32> to vector<1x256xf32>
    %63 = vector.broadcast %62 : vector<1x256xf32> to vector<2x256xf32>
    %64 = arith.mulf %61, %63 : vector<2x256xf32>
    %c240_i32_14 = arith.constant 240 : i32
    %65 = tpu.dynamic_rotate %40 by %c240_i32_14 dim 1 : vector<2x256xf32>, i32 -> vector<2x256xf32>
    %66 = vector.extract_strided_slice %0 {offsets = [6, 0], sizes = [1, 256], strides = [1, 1]} : vector<8x256xf32> to vector<1x256xf32>
    %67 = vector.broadcast %66 : vector<1x256xf32> to vector<2x256xf32>
    %68 = arith.mulf %65, %67 : vector<2x256xf32>
    %c239_i32_15 = arith.constant 239 : i32
    %69 = tpu.dynamic_rotate %40 by %c239_i32_15 dim 1 : vector<2x256xf32>, i32 -> vector<2x256xf32>
    %70 = vector.extract_strided_slice %0 {offsets = [7, 0], sizes = [1, 256], strides = [1, 1]} : vector<8x256xf32> to vector<1x256xf32>
    %71 = vector.broadcast %70 : vector<1x256xf32> to vector<2x256xf32>
    %72 = arith.mulf %69, %71 : vector<2x256xf32>
    %73 = tpu.concatenate %44, %48, %52, %56, %40, %60, %64, %68, %72 in 0 : vector<2x256xf32>, vector<2x256xf32>, vector<2x256xf32>, vector<2x256xf32>, vector<2x256xf32>, vector<2x256xf32>, vector<2x256xf32>, vector<2x256xf32>, vector<2x256xf32> -> vector<18x256xf32>
    %cst_16 = arith.constant dense<0.000000e+00> : vector<2x256xf32>
    %74 = tpu.matmul %2, %73, %cst_16 {dimension_numbers = #tpu.dot_dimension_numbers<[1], [0], [0], [1], [0, 0, 1, 1], [], []>} : vector<2x18xf32>, vector<18x256xf32>, vector<2x256xf32> -> vector<2x256xf32>
    %75 = math.tanh %74 : vector<2x256xf32>
    %c0_17 = arith.constant 0 : index
    %c0_18 = arith.constant 0 : index
    %76 = vector.load %arg5[%c0_17, %c0_18] : memref<2x256xf32, #tpu.memory_space<vmem>>, vector<2x256xf32>
    tpu.vector_store %arg5[%c0_17, %c0_18], %75 {strides = array<i32>} : memref<2x256xf32, #tpu.memory_space<vmem>>, vector<2x256xf32>,
    return
  }
  func.func @transform_0(%arg0: i32) -> (i32, i32) {
    %c0_i32 = arith.constant 0 : i32
    %c0_i32_0 = arith.constant 0 : i32
    return %c0_i32, %arg0 : i32, i32
  }
  func.func @transform_1(%arg0: i32) -> (i32, i32) {
    %c0_i32 = arith.constant 0 : i32
    %c0_i32_0 = arith.constant 0 : i32
    %c0_i32_1 = arith.constant 0 : i32
    return %c0_i32, %c0_i32_0 : i32, i32
  }
  func.func @transform_2(%arg0: i32) -> (i32, i32) {
    %c0_i32 = arith.constant 0 : i32
    %c0_i32_0 = arith.constant 0 : i32
    %c0_i32_1 = arith.constant 0 : i32
    return %c0_i32, %c0_i32_0 : i32, i32
  }
  func.func @transform_3(%arg0: i32) -> (i32, i32) {
    %c0_i32 = arith.constant 0 : i32
    %c0_i32_0 = arith.constant 0 : i32
    %c0_i32_1 = arith.constant 0 : i32
    return %c0_i32, %c0_i32_0 : i32, i32
  }
  func.func @transform_4(%arg0: i32) -> (i32, i32) {
    %c0_i32 = arith.constant 0 : i32
    %c0_i32_0 = arith.constant 0 : i32
    return %c0_i32, %arg0 : i32, i32
  }
}

</mosaic_0001>

<bundles_post_ra>
// kernel: tpu_custom_call.1
= control target key start
LH: loop header
LB: loop body
LE: loop exit
PB: predicated region body
PF: predicated region fallthrough
CT: control target
= control target key end

     0   :  { %9 = vsyncpa [#allocation3], 0  ;;  %s1475_s0 = inlined_call_operand.hbm [shape: f32[4,512], index: 0, kind: input, shape index: {}]   ;;  %s1476_s1 = inlined_call_operand.hbm [shape: f32[8,256], index: 1, kind: input, shape index: {}]   ;;  %s1477_s2 = inlined_call_operand.vmem [shape: f32[2,36], index: 2, kind: input, shape index: {}]   ;;  %s1478_s3 = inlined_call_operand.vmem [shape: f32[2,18], index: 3, kind: input, shape index: {}]   ;;  %s1479_s4 = inlined_call_operand.hbm [shape: f32[2,512], index: 4, kind: output, shape index: {}]  }
   0x1   :  { %11 = vsyncpa [#allocation3 + $0x1], 0 }
   0x2   :  { %12 = vsyncpa [#allocation6], 0 }
   0x3   :  { %13 = vsyncpa [#allocation4], 0 }
   0x4   :  { %15 = vsyncpa [#allocation4 + $0x1], 0  ;;  %s1054_s15 = smov 0   ;;  %s1056_s16 = smov 0  }
   0x5   :  { %s1058_s17 = smov 0   ;;  %s1060_s18 = smov 0  }
   0x6 LB: > { %s1075_s19 = sadd.s32 4294967295, %s1015_s18   ;;  %s797_s20 = sadd.s32 4294967294, %s1015_s18   ;;  %s1015_s18 = sphi %s1060_s18, %s1502_s18   ;;  %s1011_s17 = sphi %s1058_s17, %s1501_s17   ;;  %s1007_s16 = sphi %s1056_s16, %s1500_s16   ;;  %s1003_s15 = sphi %s1054_s15, %s1499_s15  }
   0x7   : > { %p41_p0 = scmp.ne.s32.totalorder %s1007_s16, %s1003_s15  ;;  %p1480_p1 = scmp.eq.s32.totalorder %s1075_s19, 0 }
   0x8   : > { %p134_p3 = scmp.eq.s32.totalorder %s797_s20, 1  ;;  %p798_p5 = scmp.ge.s32.totalorder %s1015_s18, 1 }
   0x9   : > { %p1084_p4 = por %p1480_p1, %p41_p0  ;;  %p141_p7 = scmp.lt.s32.totalorder %s1015_s18, 3 }
   0xa   : > { %p1089_p6 = por %p134_p3, %p41_p0  ;;  %s1017_s24 = smov [#allocation5]  }
   0xb   : > { %s1484_s21 = scalar_select %p1084_p4, 1, 0 }
   0xc   : > { %s1485_s22 = scalar_select %p1089_p6, 1, 0 }
   0xd   : > { %p1094_p8 = pnand %p798_p5, %p141_p7  ;;  %s154_s25 = sshll.u32 %s1017_s24, 4  ;;  %s155_s25 = int_to_ptr.vmem [resolvable:$true] %s154_s25 }
   0xe   : > { %s1102_s26 = sadd.s32 1, %s1015_s18   ;;  %s28_s30 = sadd.s32 1, %s1011_s17 }
   0xf   : > { %s1486_s23 = scalar_select %p1094_p8, 1, 0 }
  0x10   : > { %p830_p10 = pneg %p1094_p8  ;;  %s25_s28 = ssub.s32 %s1015_s18, %s1102_s26 }
  0x11   : > { %p1112_p12 = scmp.eq.s32.totalorder %s25_s28, 0  ;;  %p35_p13 = scmp.ne.s32.totalorder %s1011_s17, %s1007_s16 }
  0x12   : > { %p1106_p11 = pnand %p830_p10, %p1480_p1  ;;  %s904_s5 = scalar_lea.vmem %s155_s25, 256 }
  0x13   : > { %p905_p3 = scmp.ne.s32.totalorder %s155_s25, %s904_s5  ;;  %p912_p9 = scmp.lt.s32.totalorder %s155_s25, %s155_s25 }
  0x14   : > { %p895_p0 = pneg %p1106_p11  ;;  %p913_p2 = scmp.lt.s32.totalorder %s904_s5, %s904_s5 }
  0x16   : > { %p907_p5 = pnand %p905_p3, %p895_p0  ;;  %p914_p10 = por %p913_p2, %p912_p9 }
  0x18   : > { %p908_p7 = pneg %p907_p5 }
  0x1a   : > { %p915_p1 = pnand %p914_p10, %p908_p7 }
  0x1c   : > { %918 = shalt.err (!%p915_p1)
}
  0x1d   : > { %833 = dma.hbm_to_vmem [thread:$0]  (!%p1106_p11), %s1476_s1, 256, %s155_s25, [#allocation6]  }
  0x1e   : > { %s1129_s8 = scalar_select %p1112_p12, %s1011_s17, %s28_s30  }
  0x1f   : > { %p36_p1 = scmp.eq.s32.totalorder %s1015_s18, 0  ;;  %p1489_p2 = scmp.eq.s32.totalorder %s1075_s19, 1 }
  0x20   : > { %p843_p0 = scmp.lt.s32.totalorder %s1015_s18, 2  ;;  %s171_s10 = sand.u32 1, %s1011_s17  }
  0x21   : > { %p1137_p9 = por %p1489_p2, %p35_p13  ;;  %p37_p3 = por %p36_p1, %p35_p13 }
  0x22   : > { %s801_s11 = sshll.u32 %s171_s10, 3  ;;  %s820_s12 = sshll.u32 %s1015_s18, 7 }
  0x23   : > { %s1490_s9 = scalar_select %p1137_p9, 1, 0 }
  0x24   : > { %s1150_s20 = scalar_lea.hbm %s1475_s0, %s820_s12  ;;  %s175_s24 = scalar_lea.vmem [#allocation2], %s801_s11 }
  0x25   : > { %s183_s25 = sshll.u32 %s175_s24, 4  ;;  %p1152_p11 = pnand %p843_p0, %p37_p3  ;;  %s184_s25 = int_to_ptr.vmem [resolvable:$true] %s183_s25 }
  0x26   : > { %s172_s28 = scalar_lea.sflag [#allocation3], %s171_s10  ;;  %s919_s29 = scalar_lea.hbm %s1150_s20, 128 }
  0x27   : > { %p920_p12 = scmp.ne.s32.totalorder %s1150_s20, %s919_s29  ;;  %p921_p13 = pneg %p1152_p11 }
  0x28   : > { %s924_s6 = scalar_lea.hbm %s1475_s0, 256  ;;  %p925_p10 = scmp.lt.s32.totalorder %s1150_s20, %s1475_s0 }
  0x29   : > { %p922_p5 = pnand %p921_p13, %p920_p12  ;;  %p926_p1 = scmp.lt.s32.totalorder %s924_s6, %s919_s29 }
  0x2b   : > { %p923_p7 = pneg %p922_p5  ;;  %p927_p2 = por %p926_p1, %p925_p10 }
  0x2d   : > { %p928_p0 = pnand %p927_p2, %p923_p7 }
  0x2f   : > { %931 = shalt.err (!%p928_p0)
}
  0x30   : > { %s932_s12 = scalar_lea.vmem %s184_s25, 128  ;;  %s1018_s10 = smov [#allocation2]  }
  0x31   : > { %p933_p3 = scmp.ne.s32.totalorder %s184_s25, %s932_s12  ;;  %s937_s13 = sshll.u32 %s1018_s10, 4  ;;  %s938_s13 = int_to_ptr.vmem [resolvable:$false] %s937_s13 }
  0x32   : > { %s939_s14 = scalar_lea.vmem %s938_s13, 256  ;;  %p940_p12 = scmp.lt.s32.totalorder %s184_s25, %s938_s13 }
  0x33   : > { %p935_p6 = pnand %p933_p3, %p921_p13  ;;  %p941_p5 = scmp.lt.s32.totalorder %s939_s14, %s932_s12 }
  0x35   : > { %p936_p9 = pneg %p935_p6  ;;  %p942_p4 = por %p941_p5, %p940_p12 }
  0x37   : > { %p943_p8 = pnand %p942_p4, %p936_p9 }
  0x39   : > { %946 = shalt.err (!%p943_p8)
}
  0x3a   : > { %837 = dma.hbm_to_vmem [thread:$0]  (!%p1152_p11), %s1150_s20, 128, %s184_s25, %s172_s28  }
  0x3b   : > { %p1492_p7 = scmp.ne.s32.totalorder %s1486_s23, 0 }
  0x3c   : > { %s1173_s24 = sand.u32 (!%p1492_p7), 1, %s1007_s16   ;;  %p1493_p6 = scmp.ne.s32.totalorder (!%p1492_p7), %s1484_s21, 0 }
  0x3d   : > { %192 = sbr.rel (%p1492_p7) target bundleno = 794 (0x31a), region = 36  ;;  %s805_s29 = sshll.u32 (!%p1492_p7), %s1173_s24, 3 }
  0x3e   : > { %s195_s30 = scalar_lea.sflag (!%p1492_p7), [#allocation3], %s1173_s24  ;;  %s198_s5 = scalar_lea.vmem (!%p1492_p7), [#allocation2], %s805_s29 }
  0x42   : > { %990 = dma.done.wait (%p1493_p6), %s195_s30, 128  }
  0x43   : > { %992 = vsyncadd (%p1493_p6), %s195_s30, 4294967168  ;;  %p1494_p4 = scmp.eq.s32.totalorder %s1075_s19, 0 }
  0x45   : > { %994 = dma.done.wait (%p1494_p4), [#allocation6], 256   ;;  %p1495_p8 = pmov %p1494_p4 }
  0x46   : > { %v1185_v0 = vld [vmem:[%s198_s5] sm:$0xff]  ;;  %s1019_s23 = smov 111   ;;  %s1020_s20 = smov 112   ;;  %v1025_v2 = vmov 0.0   ;;  %v241_v3 = vlaneseq  ;;  %v1228_v7 = vld [vmem:[#allocation5] sm:$0xff]  ;;  %v1230_v8 = vld [vmem:[#allocation5 + $0x8] sm:$0xff] }
  0x47   : > { %996 = vsyncadd (%p1495_p8), [#allocation6], 4294967040  ;;  %358 = vrot.lane.b32.xlu1 %v1185_v0, %s1019_s23  ;;  %341 = vrot.lane.b32.xlu0 %v1185_v0, %s1020_s20  ;;  %v1193_v1 = vcombine.high %v1185_v0, %v1185_v0  ;;  %s1021_s21 = smov 127   ;;  %s1022_s25 = smov 113   ;;  %vm399_vm2 = vcmask 1043456   ;;  %vm408_vm9 = vcmask 293888  }
  0x48   : > { %s1023_s27 = smov 1   ;;  %s1024_s28 = smov 16   ;;  %482 = vmatprep.mubr.f32.mxu0 %v1025_v2  ;;  %681 = vmatprep.mubr.f32.mxu1 %v1025_v2  ;;  %v1223_v4 = vshrl.u32 %v241_v3, 7  ;;  %v1225_v5 = vand.u32 127, %v241_v3  ;;  %vm593_vm10 = vcmask 1041408   ;;  %vm598_vm11 = vcmask 1045504  }
  0x49   : > { %s1026_s6 = smov 15   ;;  %s1027_s7 = smov 17   ;;  %vm607_vm12 = vcmask 146432  }
  0x4a   : > { %v367_v6 = vsub.s32 7, %v1223_v4  ;;  %v316_v11 = vsub.s32 4, %v1223_v4  ;;  %vm362_vm0 = vcmp.lt.s32.totalorder %v1225_v5, 111  ;;  %v350_v13 = vsub.s32 6, %v1223_v4  ;;  %s807_s14 = sshll.u32 %s1173_s24, 2  ;;  %s821_s29 = sshll.u32 %s1075_s19, 6 }
  0x4b   : > { %307 = vrot.lane.b32.xlu0 %v1185_v0, %s1021_s21  ;;  %360 = vrot.lane.b32.xlu1 %v1193_v1, %s1019_s23  ;;  %vm311_vm1 = vcmp.lt.s32.totalorder %v1225_v5, 127  ;;  %v333_v17 = vsub.s32 5, %v1223_v4  ;;  %vm345_vm3 = vcmp.lt.s32.totalorder %v1225_v5, 112  ;;  %vm328_vm4 = vcmp.lt.s32.totalorder %v1225_v5, 113  ;;  %s226_s30 = scalar_lea.vmem [#allocation7], %s807_s14  ;;  %p1496_p11 = scmp.ne.s32.totalorder %s1490_s9, 0 }
  0x4c   : > { %v1235_v12 = vrot.slane %v1228_v7, %v367_v6  ;;  %v1239_v14 = vrot.slane %v1230_v8, %v367_v6  ;;  %v1248_v20 = vrot.slane %v1230_v8, %v316_v11  ;;  %v1253_v22 = vrot.slane %v1228_v7, %v350_v13  ;;  %s717_s5 = sshll.u32 %s226_s30, 4  ;;  %s718_s5 = int_to_ptr.vmem [resolvable:$true] %s717_s5 }
  0x4d   : > { %v1256_v23 = vrot.slane %v1230_v8, %v350_v13  ;;  %v1260_v25 = vrot.slane %v1228_v7, %v316_v11  ;;  %v1265_v28 = vrot.slane %v1228_v7, %v333_v17  ;;  %v1280_v36 = vrot.slane %v1230_v8, %v333_v17 }
  0x4e   : > { %v299_v43 = vsub.s32 3, %v1223_v4  ;;  %vm294_vm5 = vcmp.lt.s32.totalorder %v1225_v5, 1  ;;  %v265_v55 = vsub.s32 1, %v1223_v4  ;;  %v282_v59 = vsub.s32 2, %v1223_v4 }
  0x4f   : > { %309 = vrot.lane.b32.xlu1 %v1193_v1, %s1021_s21  ;;  %343 = vrot.lane.b32.xlu0 %v1193_v1, %s1020_s20  ;;  %vm260_vm6 = vcmp.lt.s32.totalorder %v1225_v5, 16  ;;  %v248_v63 = vsub.s32 0, %v1223_v4  ;;  %vm277_vm7 = vcmp.lt.s32.totalorder %v1225_v5, 15  ;;  %vm243_vm8 = vcmp.lt.s32.totalorder %v1225_v5, 17 }
  0x50   : > { %v1294_v53 = vrot.slane %v1228_v7, %v299_v43  ;;  %v1297_v54 = vrot.slane %v1230_v8, %v299_v43  ;;  %v1314_v6 = vrot.slane %v1228_v7, %v265_v55 }
  0x53   : > { %326 = vrot.lane.b32.xlu1 %v1193_v1, %s1022_s25  ;;  %324 = vrot.lane.b32.xlu0 %v1185_v0, %s1022_s25 }
  0x57   : > { %292 = vrot.lane.b32.xlu1 %v1193_v1, %s1023_s27  ;;  %290 = vrot.lane.b32.xlu0 %v1185_v0, %s1023_s27 }
  0x5b   : > { %258 = vrot.lane.b32.xlu1 %v1193_v1, %s1024_s28  ;;  %256 = vrot.lane.b32.xlu0 %v1185_v0, %s1024_s28 }
  0x5f   : > { %275 = vrot.lane.b32.xlu1 %v1193_v1, %s1026_s6  ;;  %273 = vrot.lane.b32.xlu0 %v1185_v0, %s1026_s6 }
  0x63   : > { %239 = vrot.lane.b32.xlu1 %v1193_v1, %s1027_s7  ;;  %237 = vrot.lane.b32.xlu0 %v1185_v0, %s1027_s7 }
  0xb9   : > { %v359_v9 = vpop.permute.xlu1 %358  ;;  %v342_v10 = vpop.permute.xlu0 %341 }
  0xbd   : > { %v308_v15 = vpop.permute.xlu0 %307  ;;  %v361_v16 = vpop.permute.xlu1 %360 }
  0xbe   : > { %v363_v18 = vsel %vm362_vm0, %v359_v9, %v361_v16  ;;  %v364_v19 = vsel %vm362_vm0, %v361_v16, %v359_v9  ;;  %v1324_v9 = vrot.slane %v1230_v8, %v282_v59  ;;  %v1335_v16 = vrot.slane %v1230_v8, %v248_v63 }
  0xbf   : > { %v373_v21 = vmul.f32 %v1235_v12, %v363_v18  ;;  %v374_v24 = vmul.f32 %v1239_v14, %v364_v19 }
  0xc1   : > { %v310_v26 = vpop.permute.xlu1 %309  ;;  %v344_v27 = vpop.permute.xlu0 %343  ;;  %808 = vmatprep.subr.msk.mxu0 %vm399_vm2, %v374_v24 }
  0xc2   : > { %v312_v29 = vsel %vm311_vm1, %v308_v15, %v310_v26  ;;  %v313_v30 = vsel %vm311_vm1, %v310_v26, %v308_v15  ;;  %v346_v31 = vsel %vm345_vm3, %v342_v10, %v344_v27  ;;  %v347_v32 = vsel %vm345_vm3, %v344_v27, %v342_v10  ;;  %809 = vmatpush1.msk.msra.mxu0 %vm399_vm2, %v373_v21 }
  0xc3   : > { %v323_v33 = vmul.f32 %v1248_v20, %v313_v30  ;;  %v356_v34 = vmul.f32 %v1253_v22, %v346_v31  ;;  %v357_v35 = vmul.f32 %v1256_v23, %v347_v32  ;;  %v322_v37 = vmul.f32 %v1260_v25, %v312_v29 }
  0xc4   : > { %v1332_v15 = vrot.slane %v1228_v7, %v248_v63 }
  0xc5   : > { %v327_v38 = vpop.permute.xlu1 %326  ;;  %v325_v39 = vpop.permute.xlu0 %324  ;;  %v390_v40 = vrot.slane %v323_v33, 4  ;;  %v395_v44 = vrot.slane %v356_v34, 4  ;;  %v396_v45 = vrot.slane %v357_v35, 4  ;;  %v389_v48 = vrot.slane %v322_v37, 4 }
  0xc6   : > { %v329_v41 = vsel %vm328_vm4, %v325_v39, %v327_v38  ;;  %v330_v42 = vsel %vm328_vm4, %v327_v38, %v325_v39 }
  0xc7   : > { %v339_v46 = vmul.f32 %v1265_v28, %v329_v41  ;;  %v340_v47 = vmul.f32 %v1280_v36, %v330_v42  ;;  %v405_v58 = vsel %vm399_vm2, %v1193_v1, %v390_v40  ;;  %v404_v60 = vsel %vm399_vm2, %v1185_v0, %v389_v48  ;;  %v231_v41 = vld [vmem:[%s1477_s2] sm:$0x3] }
  0xc8   : > { %v1317_v1 = vrot.slane %v1230_v8, %v265_v55  ;;  %v1321_v0 = vrot.slane %v1228_v7, %v282_v59 }
  0xc9   : > { %v293_v49 = vpop.permute.xlu1 %292  ;;  %v291_v50 = vpop.permute.xlu0 %290  ;;  %v407_v51 = vsel %vm399_vm2, %v340_v47, %v396_v45  ;;  %v406_v52 = vsel %vm399_vm2, %v339_v46, %v395_v44 }
  0xca   : > { %442 = vmatprep.subr.mxu0 %v407_v51  ;;  %v295_v56 = vsel %vm294_vm5, %v291_v50, %v293_v49  ;;  %v296_v57 = vsel %vm294_vm5, %v293_v49, %v291_v50 }
  0xcb   : > { %443 = vmatpush1.msra.mxu0 %v406_v52  ;;  %v305_v2 = vmul.f32 %v1294_v53, %v296_v57  ;;  %v306_v3 = vmul.f32 %v1297_v54, %v295_v56 }
  0xcc   : > { %444 = vmatprep.subr.mxu0 %v405_v58 }
  0xcd   : > { %v259_v61 = vpop.permute.xlu1 %258  ;;  %v257_v62 = vpop.permute.xlu0 %256  ;;  %445 = vmatpush1.msra.mxu0 %v404_v60  ;;  %v383_v17 = vrot.slane %v305_v2, 4  ;;  %v384_v18 = vrot.slane %v306_v3, 4 }
  0xce   : > { %v261_v4 = vsel %vm260_vm6, %v257_v62, %v259_v61  ;;  %v262_v10 = vsel %vm260_vm6, %v259_v61, %v257_v62 }
  0xcf   : > { %v271_v24 = vmul.f32 %v1314_v6, %v262_v10  ;;  %v272_v26 = vmul.f32 %v1317_v1, %v261_v4 }
  0xd1   : > { %v276_v11 = vpop.permute.xlu1 %275  ;;  %v274_v13 = vpop.permute.xlu0 %273  ;;  %v377_v34 = vrot.slane %v271_v24, 4  ;;  %v378_v35 = vrot.slane %v272_v26, 4 }
  0xd2   : > { %v278_v19 = vsel %vm277_vm7, %v274_v13, %v276_v11  ;;  %v279_v21 = vsel %vm277_vm7, %v276_v11, %v274_v13 }
  0xd3   : > { %v288_v27 = vmul.f32 %v1321_v0, %v279_v21  ;;  %v289_v7 = vmul.f32 %v1324_v9, %v278_v19 }
  0xd5   : > { %v240_v29 = vpop.permute.xlu1 %239  ;;  %v238_v30 = vpop.permute.xlu0 %237  ;;  %v403_v8 = vsel %vm399_vm2, %v289_v7, %v384_v18  ;;  %v402_v31 = vsel %vm399_vm2, %v288_v27, %v383_v17 }
  0xd6   : > { %v244_v32 = vsel %vm243_vm8, %v238_v30, %v240_v29  ;;  %v245_v33 = vsel %vm243_vm8, %v240_v29, %v238_v30  ;;  %446 = vmatprep.subr.mxu0 %v403_v8 }
  0xd7   : > { %v254_v37 = vmul.f32 %v1332_v15, %v245_v33  ;;  %v255_v38 = vmul.f32 %v1335_v16, %v244_v32  ;;  %447 = vmatpush1.msra.mxu0 %v402_v31 }
  0xd9   : > { %v401_v39 = vsel %vm399_vm2, %v255_v38, %v378_v35  ;;  %v400_v40 = vsel %vm399_vm2, %v254_v37, %v377_v34 }
  0xda   : > { %448 = vmatprep.subr.mxu0 %v401_v39 }
  0xdb   : > { %449 = vmatpush1.msra.mxu0 %v400_v40 }
  0xdc   : > { %810 = vmatmul.mubr.msk.f32.vlgmr.msra.gmra.mxu0 %vm408_vm9, %v231_v41 }
 0x19c   : > { %v484_v42 = vpop.f32.mrf.mxu0 }
 0x19d   : > { %v489_v43 = vmul.f32 0.2, %v484_v42 }
 0x19e   : > { %v486_v44 = vpop.f32.mrf.mxu0 }
 0x19f   : > { %v491_v45 = vmax.f32 %v484_v42, %v489_v43  ;;  %v490_v46 = vmul.f32 0.2, %v486_v44 }
 0x1a1   : > { %v492_v47 = vmax.f32 %v486_v44, %v490_v46  ;;  %525 = vrot.lane.b32.xlu0 %v491_v45, %s1021_s21 }
 0x1a3   : > { %527 = vrot.lane.b32.xlu1 %v492_v47, %s1021_s21  ;;  %s715_s21 = scalar_lea.hbm %s1479_s4, %s821_s29 }
 0x1a5   : > { %533 = vrot.lane.b32.xlu0 %v491_v45, %s1022_s25 }
 0x1a7   : > { %535 = vrot.lane.b32.xlu1 %v492_v47, %s1022_s25  ;;  %s703_s25 = scalar_lea.sflag [#allocation4], %s1173_s24 }
 0x1a9   : > { %501 = vrot.lane.b32.xlu0 %v491_v45, %s1024_s28 }
 0x1ab   : > { %503 = vrot.lane.b32.xlu1 %v492_v47, %s1024_s28  ;;  %s1028_s28 = smov [#allocation7]  }
 0x1ad   : > { %541 = vrot.lane.b32.xlu0 %v491_v45, %s1020_s20 }
 0x1af   : > { %543 = vrot.lane.b32.xlu1 %v492_v47, %s1020_s20 }
 0x1b1   : > { %509 = vrot.lane.b32.xlu0 %v491_v45, %s1026_s6 }
 0x1b3   : > { %511 = vrot.lane.b32.xlu1 %v492_v47, %s1026_s6  ;;  %s951_s6 = sshll.u32 %s1028_s28, 4  ;;  %s952_s6 = int_to_ptr.vmem [resolvable:$false] %s951_s6 }
 0x1b4   : > { %s953_s19 = scalar_lea.vmem %s952_s6, 128  ;;  %p954_p1 = scmp.lt.s32.totalorder %s718_s5, %s952_s6 }
 0x1b5   : > { %549 = vrot.lane.b32.xlu0 %v491_v45, %s1019_s23 }
 0x1b7   : > { %551 = vrot.lane.b32.xlu1 %v492_v47, %s1019_s23 }
 0x1b9   : > { %493 = vrot.lane.b32.xlu0 %v491_v45, %s1027_s7 }
 0x1bb   : > { %495 = vrot.lane.b32.xlu1 %v492_v47, %s1027_s7 }
 0x1bd   : > { %517 = vrot.lane.b32.xlu0 %v491_v45, %s1023_s27 }
 0x1bf   : > { %519 = vrot.lane.b32.xlu1 %v492_v47, %s1023_s27  ;;  %s947_s27 = scalar_lea.vmem %s718_s5, 64 }
 0x1c0   : > { %p948_p9 = scmp.ne.s32.totalorder %s718_s5, %s947_s27  ;;  %p955_p2 = scmp.lt.s32.totalorder %s953_s19, %s947_s27 }
 0x1c2   : > { %p949_p13 = pnand %p948_p9, %p1496_p11  ;;  %p956_p0 = por %p955_p2, %p954_p1 }
 0x1c4   : > { %p950_p10 = pneg %p949_p13 }
 0x1c6   : > { %p957_p3 = pnand %p956_p0, %p950_p10 }
 0x213   : > { %v526_v48 = vpop.permute.xlu0 %525 }
 0x215   : > { %v528_v49 = vpop.permute.xlu1 %527 }
 0x216   : > { %v529_v57 = vsel %vm311_vm1, %v526_v48, %v528_v49  ;;  %v530_v58 = vsel %vm311_vm1, %v528_v49, %v526_v48 }
 0x217   : > { %v534_v50 = vpop.permute.xlu0 %533  ;;  %v531_v2 = vmul.f32 %v529_v57, %v1260_v25  ;;  %v532_v3 = vmul.f32 %v530_v58, %v1248_v20 }
 0x219   : > { %v536_v51 = vpop.permute.xlu1 %535  ;;  %v577_v21 = vrot.slane %v531_v2, 6  ;;  %v578_v24 = vrot.slane %v532_v3, 6 }
 0x21a   : > { %v537_v60 = vsel %vm328_vm4, %v534_v50, %v536_v51  ;;  %v538_v61 = vsel %vm328_vm4, %v536_v51, %v534_v50 }
 0x21b   : > { %v502_v52 = vpop.permute.xlu0 %501  ;;  %v539_v10 = vmul.f32 %v537_v60, %v1265_v28  ;;  %v540_v11 = vmul.f32 %v538_v61, %v1280_v36  ;;  %v602_v32 = vsel %vm593_vm10, %v492_v47, %v578_v24  ;;  %v601_v33 = vsel %vm593_vm10, %v491_v45, %v577_v21 }
 0x21d   : > { %v504_v55 = vpop.permute.xlu1 %503  ;;  %v583_v26 = vrot.slane %v539_v10, 4  ;;  %v584_v27 = vrot.slane %v540_v11, 4 }
 0x21e   : > { %v506_v20 = vsel %vm260_vm6, %v504_v55, %v502_v52  ;;  %v505_v28 = vsel %vm260_vm6, %v502_v52, %v504_v55 }
 0x21f   : > { %v542_v56 = vpop.permute.xlu0 %541  ;;  %v507_v31 = vmul.f32 %v506_v20, %v1314_v6  ;;  %v508_v34 = vmul.f32 %v505_v28, %v1317_v1  ;;  %v603_v39 = vsel %vm399_vm2, %v601_v33, %v583_v26 }
 0x221   : > { %v544_v59 = vpop.permute.xlu1 %543  ;;  %v559_v45 = vrot.slane %v507_v31, 6  ;;  %v560_v46 = vrot.slane %v508_v34, 6 }
 0x222   : > { %v546_v62 = vsel %vm345_vm3, %v544_v59, %v542_v56  ;;  %v545_v4 = vsel %vm345_vm3, %v542_v56, %v544_v59 }
 0x223   : > { %v510_v63 = vpop.permute.xlu0 %509  ;;  %v548_v17 = vmul.f32 %v546_v62, %v1256_v23  ;;  %v547_v18 = vmul.f32 %v545_v4, %v1253_v22 }
 0x225   : > { %v512_v13 = vpop.permute.xlu1 %511  ;;  %v590_v7 = vrot.slane %v548_v17, 2  ;;  %v589_v23 = vrot.slane %v547_v18, 2 }
 0x226   : > { %v513_v35 = vsel %vm277_vm7, %v510_v63, %v512_v13  ;;  %v514_v37 = vsel %vm277_vm7, %v512_v13, %v510_v63 }
 0x227   : > { %v550_v19 = vpop.permute.xlu0 %549  ;;  %v605_v42 = vsel %vm598_vm11, %v603_v39, %v589_v23  ;;  %v515_v43 = vmul.f32 %v514_v37, %v1321_v0  ;;  %v516_v44 = vmul.f32 %v513_v35, %v1324_v9 }
 0x229   : > { %v552_v25 = vpop.permute.xlu1 %551  ;;  %v565_v9 = vrot.slane %v515_v43, 4  ;;  %v566_v52 = vrot.slane %v516_v44, 4 }
 0x22a   : > { %v553_v36 = vsel %vm362_vm0, %v550_v19, %v552_v25  ;;  %v554_v22 = vsel %vm362_vm0, %v552_v25, %v550_v19 }
 0x22b   : > { %v555_v29 = vmul.f32 %v553_v36, %v1235_v12  ;;  %v494_v30 = vpop.permute.xlu0 %493  ;;  %v556_v8 = vmul.f32 %v554_v22, %v1239_v14  ;;  %v604_v14 = vsel %vm399_vm2, %v602_v32, %v584_v27 }
 0x22c   : > { %v606_v1 = vsel %vm598_vm11, %v604_v14, %v590_v7 }
 0x22d   : > { %811 = vmatprep.subr.msk.mxu1 %vm593_vm10, %v556_v8  ;;  %v496_v12 = vpop.permute.xlu1 %495 }
 0x22e   : > { %v497_v6 = vsel %vm243_vm8, %v494_v30, %v496_v12  ;;  %v498_v38 = vsel %vm243_vm8, %v496_v12, %v494_v30  ;;  %812 = vmatpush1.msk.msra.mxu1 %vm593_vm10, %v555_v29 }
 0x22f   : > { %v499_v40 = vmul.f32 %v498_v38, %v1332_v15  ;;  %v500_v41 = vmul.f32 %v497_v6, %v1335_v16  ;;  %645 = vmatprep.subr.mxu1 %v606_v1  ;;  %v518_v47 = vpop.permute.xlu0 %517 }
 0x230   : > { %646 = vmatpush1.msra.mxu1 %v605_v42 }
 0x231   : > { %v520_v48 = vpop.permute.xlu1 %519  ;;  %v595_v51 = vsel %vm593_vm10, %v500_v41, %v560_v46  ;;  %v594_v0 = vsel %vm593_vm10, %v499_v40, %v559_v45 }
 0x232   : > { %v521_v49 = vsel %vm294_vm5, %v518_v47, %v520_v48  ;;  %v522_v15 = vsel %vm294_vm5, %v520_v48, %v518_v47  ;;  %v597_v57 = vsel %vm399_vm2, %v595_v51, %v566_v52  ;;  %v596_v58 = vsel %vm399_vm2, %v594_v0, %v565_v9 }
 0x233   : > { %v523_v16 = vmul.f32 %v522_v15, %v1294_v53  ;;  %v524_v50 = vmul.f32 %v521_v49, %v1297_v54  ;;  %v232_v54 = vld [vmem:[%s1478_s3] sm:$0x3] }
 0x235   : > { %v571_v55 = vrot.slane %v523_v16, 2  ;;  %v572_v56 = vrot.slane %v524_v50, 2 }
 0x237   : > { %v600_v5 = vsel %vm598_vm11, %v597_v57, %v572_v56  ;;  %v599_v53 = vsel %vm598_vm11, %v596_v58, %v571_v55 }
 0x238   : > { %647 = vmatprep.subr.mxu1 %v600_v5 }
 0x239   : > { %648 = vmatpush1.msra.mxu1 %v599_v53 }
 0x23a   : > { %813 = vmatmul.mubr.msk.f32.vlgmr.msra.gmra.mxu1 %vm607_vm12, %v232_v54 }
 0x2fa   : > { %v683_v59 = vpop.f32.mrf.mxu1 }
 0x2fb   : > { %889 = vtanh.f32 %v683_v59 }
 0x2fc   : > { %v685_v60 = vpop.f32.mrf.mxu1 }
 0x2fd   : > { %891 = vtanh.f32 %v685_v60 }
 0x308   : > { %v890_v61 = vpop.eup %889 }
 0x30a   : > { %v892_v62 = vpop.eup %891 }
 0x30b   : > { %v692_v63 = vcombine.low %v890_v61, %v892_v62 }
 0x30d   : > { %814 = vst.sshfl [vmem:[%s226_s30] sm:$0x33 pattern:$0x76325410] %v692_v63 }
 0x30e   : > { %960 = shalt.err (!%p957_p3)
}
 0x30f   : > { %s961_s7 = scalar_lea.hbm %s715_s21, 64  ;;  %s965_s12 = scalar_lea.hbm %s1479_s4, 128 }
 0x310   : > { %p962_p12 = scmp.ne.s32.totalorder %s715_s21, %s961_s7  ;;  %p966_p6 = scmp.lt.s32.totalorder %s715_s21, %s1479_s4 }
 0x311   : > { %p967_p4 = scmp.lt.s32.totalorder %s965_s12, %s961_s7 }
 0x312   : > { %p963_p5 = pnand %p962_p12, %p1496_p11 }
 0x313   : > { %p968_p8 = por %p967_p4, %p966_p6 }
 0x314   : > { %p964_p7 = pneg %p963_p5 }
 0x316   : > { %p969_p9 = pnand %p968_p8, %p964_p7 }
 0x318   : > { %972 = shalt.err (!%p969_p9)
}
 0x319   : > { %828 = dma.vmem_to_hbm [thread:$0]  (%p1496_p11), %s718_s5, 64, %s715_s21, %s703_s25  }
 0x31a PF: > { %s729_s14 = sand.u32 1, %s1003_s15   ;;  %p1497_p13 = scmp.ne.s32.totalorder %s1485_s22, 0 }
 0x31b   : > { %p1498_p10 = scmp.ge.s32.totalorder %s1015_s18, 2  ;;  %s730_s29 = scalar_lea.sflag [#allocation4], %s729_s14 }
 0x31d   : > { %p839_p1 = pnand %p1498_p10, %p1497_p13 }
 0x31f   : > { %p840_p2 = pneg %p839_p1 }
 0x321   : > { %998 = dma.done.wait (%p840_p2), %s730_s29, 64  }
 0x322   : > { %1000 = vsyncadd (%p840_p2), %s730_s29, 4294967232  ;;  %p18_p0 = scmp.ge.s32.totalorder %s1102_s26, 4   ;;  %s1499_s15 = smov %s1007_s16 }
 0x323   : > { %s1500_s16 = smov %s1011_s17  ;;  %s1501_s17 = smov %s1129_s8 }
 0x324   : > { %s1502_s18 = smov %s1102_s26  ;;  %20 = sbr.rel (!%p18_p0) target bundleno = 6 (0x6), region = 85 }
 0x329   :  { %735 = vsyncpa [#allocation3], 1 }
 0x32a   :  { %737 = vsyncpa [#allocation3 + $0x1], 1 }
 0x32b   :  { %738 = vsyncpa [#allocation6], 1 }
 0x32c   :  { %739 = vsyncpa [#allocation4], 1 }
 0x32d   :  { %741 = vsyncpa [#allocation4 + $0x1], 1 }

</bundles_post_ra>
